<compile_context>
chip_gen: v7x
topology: tpu7x:2x2x1
jax: 0.10.0
libtpu: 0.0.40
codegen_flags: <defaults>
</compile_context>

<pallas_src>
import functools

import jax
import jax.numpy as jnp
import numpy as np
from jax.experimental import pallas as pl
from jax.experimental.pallas import tpu as pltpu


def _round_up(x, m):
    return (x + m - 1) // m * m


def _softmax0(x):
    """Numerically stable softmax over axis 0 (the feature / sublane axis)."""
    m = jnp.max(x, axis=0, keepdims=True)
    e = jnp.exp(x - m)
    return e / jnp.sum(e, axis=0, keepdims=True)


# ----------------------------------------------------------------------------
# Kernel: one batch tile, batch = minor (lane) axis of every ref.
# ----------------------------------------------------------------------------
def ciscrec_kernel(emb_ref, idx_ref, pp_ref, uprop_ref, bias_ref,
                   semb_ref, sbias_ref, wunf_ref, convb_ref, out_ref):
    """
    emb_ref    : (4, D, TB)  [0]=user emb, [1]=mean item emb, [2]=j, [3]=jp
    idx_ref    : (2, TB) i32 [0]=uj_s index, [1]=uj_sp index
    pp_ref     : (P, TB)     user property preference
    uprop_ref  : (P, S, TB)  user_prop
    bias_ref   : (2, TB)     item biases for j / jp
    semb_ref   : (S, D, 1)   embed_s                      (grid-resident)
    sbias_ref  : (S, 1)      s_biases                     (grid-resident)
    wunf_ref   : (2T, S*D)   unfolded Conv1d weight       (grid-resident)
    convb_ref  : (2T, 1)     Conv1d bias repeated over T  (grid-resident)
    out_ref    : (2, TB)     [0]=pos_dis, [1]=neg_dis
    """
    emb = emb_ref[...]                                         # (4, D, TB)
    ue = emb[0]                                                # (D, TB)
    is_mean = emb[1]                                           # (D, TB)
    items = emb[2:4]                                           # (2, D, TB)
    semb = semb_ref[...]                                       # (S, D, 1)
    S, D, _ = semb.shape
    TB = ue.shape[-1]

    # ---- subemb_reinforce ---------------------------------------------------
    pp_sm = _softmax0(pp_ref[...])                             # (P, TB)
    mean_ps = jnp.mean(uprop_ref[...] * pp_sm[:, None, :], axis=0)   # (S, TB)
    s_prop = semb * mean_ps[:, None, :]                        # (S, D, TB)

    # Conv1d(S->2, kernel=K) + ReLU as one unfolded matmul: (2T,S*D) @ (S*D,TB)
    s_flat = s_prop.reshape(S * D, TB)                         # tile-aligned reshape
    s_feat = jnp.maximum(
        jnp.dot(wunf_ref[...], s_flat,
                preferred_element_type=jnp.float32,
                precision=jax.lax.Precision.HIGHEST) + convb_ref[...],
        0.0)                                                   # (2T, TB) == (D, TB)

    # ---- decision_prop2 (uses the PRE-reinforce user embedding) --------------
    diff = (ue + is_mean)[None, :, :] - (semb + s_prop)        # (S, D, TB)
    pred = sbias_ref[...] - jnp.sum(diff * diff, axis=1)       # (S, TB)
    sub_weight = _softmax0(pred)                               # (S, TB)

    # ---- one-hot + embed_s row selection rebuilt in-VMEM from int indices ----
    iota_s = jax.lax.broadcasted_iota(jnp.int32, (1, S, TB), 1)        # sublane iota
    sel = (iota_s == idx_ref[...][:, None, :]).astype(jnp.float32)     # (2, S, TB)
    w = jnp.sum(sub_weight[None, :, :] * sel, axis=1)                  # (2, TB)
    subsel = jnp.sum(sel[:, :, None, :] * semb[None, :, :, :], axis=1)  # (2, D, TB)

    # ---- useremb_reinforce + predict_function3 (pos & neg fused) -------------
    u_feat = ue + s_feat                                       # (D, TB)
    uf = u_feat[None, :, :]
    d = (jnp.square(uf + subsel - items)                       # sub_emb row 0
         + jnp.square(uf + uf - items)                         # sub_emb row 1 (intentional)
         + jnp.square(uf + s_feat[None, :, :] - items))        # sub_emb row 2
    out_ref[...] = bias_ref[...] - w * jnp.sum(d, axis=1)      # (2, TB)


# ----------------------------------------------------------------------------
# Wrapper glue
# ----------------------------------------------------------------------------
def _unfold_conv_weight(conv_w, D):
    """(2, S, K) Conv1d weight -> (2*T, S*D) unfolded matrix, T = D - K + 1."""
    O, S, K = conv_w.shape
    T = D - K + 1
    W = jnp.zeros((O, T, S, D), conv_w.dtype)
    for t in range(T):
        W = W.at[:, t, :, t:t + K].set(conv_w)
    return W.reshape(O * T, S * D)


def init_params(key, user_num, item_num, sub_num, dim, num_prop):
    K = dim - 3
    ks = jax.random.split(key, 6)
    return {
        "embed_user": 0.1 * jax.random.normal(ks[0], (user_num, dim), jnp.float32),
        "embed_item": 0.1 * jax.random.normal(ks[1], (item_num, dim), jnp.float32),
        "embed_s":    0.1 * jax.random.normal(ks[2], (sub_num, dim), jnp.float32),
        "s_biases":   jnp.zeros((1, sub_num), jnp.float32),
        "i_biases":   jnp.zeros((item_num, 1), jnp.float32),
        "prop_pref":  0.1 * jax.random.normal(ks[3], (user_num, num_prop), jnp.float32),
        "conv_w":     0.1 * jax.random.normal(ks[4], (2, sub_num, K), jnp.float32),
        "conv_b":     0.1 * jax.random.normal(ks[5], (2,), jnp.float32),
    }


def ciscrec_forward(params, user, i_s, uj_s, uj_sp, j, jp, user_prop,
                    *, tile_b=4096):
    B = user.shape[0]
    D = params["embed_user"].shape[1]
    S = params["embed_s"].shape[0]
    P = params["prop_pref"].shape[1]
    K = params["conv_w"].shape[2]
    T = D - K + 1
    assert 2 * T == D, "CISCRec requires latent_dimension == 8 (2*(D-K+1) == D)."

    # --- glue: embedding-table gathers (data-dependent, stays in XLA) --------
    user_embed = params["embed_user"][user]                      # (B, D)
    is_mean = jnp.mean(params["embed_item"][i_s], axis=1)        # (B, D) fused gather+mean
    j_embed = params["embed_item"][j]
    jp_embed = params["embed_item"][jp]
    prop_pref = params["prop_pref"][user]                        # (B, P)
    j_bias = params["i_biases"][j][:, 0]                         # (B,)
    jp_bias = params["i_biases"][jp][:, 0]

    # --- lane-dense layout: batch -> minor (lane) axis, pos/neg merged --------
    emb_t = jnp.stack([user_embed, is_mean, j_embed, jp_embed], 0)        # (4, B, D)
    emb_t = emb_t.transpose(0, 2, 1)                                      # (4, D, B)
    idx_t = jnp.stack([uj_s, uj_sp], 0).astype(jnp.int32)                 # (2, B)
    pp_t = prop_pref.T                                                    # (P, B)
    uprop_t = user_prop.astype(jnp.float32).transpose(1, 2, 0)            # (P, S, B)
    bias_t = jnp.stack([j_bias, jp_bias], 0)                              # (2, B)

    semb_t = params["embed_s"][:, :, None]                                # (S, D, 1)
    sbias_t = params["s_biases"].T                                        # (S, 1)
    wunf = _unfold_conv_weight(params["conv_w"], D)                       # (2T, S*D)
    convb = jnp.repeat(params["conv_b"], T)[:, None]                      # (2T, 1)

    # --- batch tiling: pad B to a multiple of a lane-aligned TILE_B ----------
    tile_b = max(128, _round_up(tile_b, 128))
    tile_b = min(tile_b, _round_up(B, 128))
    Bp = _round_up(B, tile_b)

    def pad_b(x):
        pad = Bp - x.shape[-1]
        if pad == 0:
            return x
        return jnp.pad(x, [(0, 0)] * (x.ndim - 1) + [(0, pad)])

    emb_t, idx_t, pp_t, uprop_t, bias_t = map(
        pad_b, (emb_t, idx_t, pp_t, uprop_t, bias_t))

    grid = (Bp // tile_b,)
    b3 = lambda i: (0, 0, i)        # batch-tiled 3-D inputs
    b2 = lambda i: (0, i)           # batch-tiled 2-D inputs
    r3 = lambda i: (0, 0, 0)        # grid-resident params
    r2 = lambda i: (0, 0)

    in_specs = [
        pl.BlockSpec((4, D, tile_b), b3),      # user / item-mean / j / jp embeddings
        pl.BlockSpec((2, tile_b), b2),         # uj_s / uj_sp int32 indices
        pl.BlockSpec((P, tile_b), b2),         # prop_pref
        pl.BlockSpec((P, S, tile_b), b3),      # user_prop
        pl.BlockSpec((2, tile_b), b2),         # item biases
        pl.BlockSpec((S, D, 1), r3),           # embed_s        (resident)
        pl.BlockSpec((S, 1), r2),              # s_biases       (resident)
        pl.BlockSpec((2 * T, S * D), r2),      # unfolded conv  (resident)
        pl.BlockSpec((2 * T, 1), r2),          # conv bias      (resident)
    ]

    ins = (emb_t, idx_t, pp_t, uprop_t, bias_t, semb_t, sbias_t, wunf, convb)
    cost = pl.CostEstimate(
        flops=int(Bp) * (4 * T * S * D + 12 * S * D + 8 * P * S + 40 * D),
        transcendentals=int(Bp) * (P + S),
        bytes_accessed=int(4 * (sum(int(x.size) for x in ins) + 2 * Bp)),
    )

    out = pl.pallas_call(
        ciscrec_kernel,
        out_shape=jax.ShapeDtypeStruct((2, Bp), jnp.float32),
        grid=grid,
        in_specs=in_specs,
        out_specs=pl.BlockSpec((2, tile_b), b2),
        compiler_params=pltpu.CompilerParams(
            dimension_semantics=("parallel",)),
        cost_estimate=cost,
    )(*ins)

    return out[0, :B], out[1, :B], j_bias, jp_bias


# ----------------------------------------------------------------------------
# Pure-jnp reference (direct translation of the PyTorch forward) for validation
# ----------------------------------------------------------------------------
def ciscrec_forward_ref(params, user, i_s, uj_s, uj_sp, j, jp, user_prop):
    B = user.shape[0]
    D = params["embed_user"].shape[1]
    S = params["embed_s"].shape[0]
    K = params["conv_w"].shape[2]
    T = D - K + 1

    user_embed = params["embed_user"][user]
    is_embed = jnp.mean(params["embed_item"][i_s], axis=1)
    j_embed = params["embed_item"][j]
    jp_embed = params["embed_item"][jp]
    ujs_embed = params["embed_s"][uj_s]
    ujsp_embed = params["embed_s"][uj_sp]
    prop_pref = params["prop_pref"][user]
    j_bias = params["i_biases"][j][:, 0]
    jp_bias = params["i_biases"][jp][:, 0]

    # subemb_reinforce
    s_embed = jnp.broadcast_to(params["embed_s"][None], (B, S, D))
    pp = jax.nn.softmax(prop_pref, axis=1)
    prop_scores = jnp.einsum("imj,im->imj", user_prop, pp)
    s_prop_emb = jnp.mean(jnp.einsum("ijk,imj->imjk", s_embed, prop_scores), axis=1)
    w, b = params["conv_w"], params["conv_b"]
    conv = jnp.stack(
        [jnp.einsum("bck,ock->bo", s_prop_emb[:, :, t:t + K], w) for t in range(T)],
        axis=2) + b[None, :, None]
    s_feat = jax.nn.relu(conv).reshape(B, -1)

    # decision_prop2
    pred = params["s_biases"] - jnp.sum(
        jnp.square(user_embed[:, None] + is_embed[:, None]
                   - (params["embed_s"][None] + s_prop_emb)), axis=2)
    sub_weight = jax.nn.softmax(pred, axis=1)

    u_feat = user_embed + s_feat

    def pf3(item_j, sub_emb, uj):
        oh = jax.nn.one_hot(uj, S)
        ww = jnp.sum(sub_weight * oh, axis=1)[:, None]
        d = jnp.sum(jnp.square(u_feat[:, None] + sub_emb - item_j[:, None]), axis=1)
        return jnp.sum(ww * (-d), axis=1)

    sub_pos = jnp.stack([ujs_embed, u_feat, s_feat], axis=1)
    sub_neg = jnp.stack([ujsp_embed, u_feat, s_feat], axis=1)
    pos = j_bias + pf3(j_embed, sub_pos, uj_s)
    neg = jp_bias + pf3(jp_embed, sub_neg, uj_sp)
    return pos, neg, j_bias, jp_bias


if __name__ == "__main__":
    # Small, self-consistent sizes. D must be 8 (conv output 2*(D-K+1) == D).
    B, D, S, P, L = 300, 8, 6, 5, 3
    USER_NUM, ITEM_NUM = 50, 80

    key = jax.random.PRNGKey(0)
    kp, kb, k1, k2, k3, k4, k5, k6, k7 = jax.random.split(key, 9)

    params = init_params(kp, USER_NUM, ITEM_NUM, S, D, P)
    # Non-zero item biases so the bias-add path is actually exercised.
    params["i_biases"] = 0.1 * jax.random.normal(kb, (ITEM_NUM, 1), jnp.float32)

    user = jax.random.randint(k1, (B,), 0, USER_NUM)
    i_s = jax.random.randint(k2, (B, L), 0, ITEM_NUM)
    uj_s = jax.random.randint(k3, (B,), 0, S)
    uj_sp = jax.random.randint(k4, (B,), 0, S)
    j = jax.random.randint(k5, (B,), 0, ITEM_NUM)
    jp = jax.random.randint(k6, (B,), 0, ITEM_NUM)
    user_prop = jax.random.normal(k7, (B, P, S), jnp.float32)

    # tile_b=128 at this toy size exercises grid=(3,) plus batch padding;
    # production sizes use the default 4096-row lane tiles.
    fwd = jax.jit(functools.partial(ciscrec_forward, tile_b=128))
    pos, neg, jb, jpb = jax.block_until_ready(
        fwd(params, user, i_s, uj_s, uj_sp, j, jp, user_prop))

    pos_r, neg_r, jb_r, jpb_r = ciscrec_forward_ref(
        params, user, i_s, uj_s, uj_sp, j, jp, user_prop)

    np.testing.assert_allclose(np.asarray(pos), np.asarray(pos_r), rtol=2e-4, atol=2e-4)
    np.testing.assert_allclose(np.asarray(neg), np.asarray(neg_r), rtol=2e-4, atol=2e-4)
    np.testing.assert_allclose(np.asarray(jb), np.asarray(jb_r), rtol=1e-5, atol=1e-6)
    np.testing.assert_allclose(np.asarray(jpb), np.asarray(jpb_r), rtol=1e-5, atol=1e-6)

    print("KERNEL_OK")
</pallas_src>

<mosaic_0001>
module attributes {stable_mosaic.version = 11 : i64} {
  func.func @ciscrec_kernel(%arg0: i32, %arg1: memref<4x8x128xf32, #tpu.memory_space<vmem>>, %arg2: memref<2x128xi32, #tpu.memory_space<vmem>>, %arg3: memref<5x128xf32, #tpu.memory_space<vmem>>, %arg4: memref<5x6x128xf32, #tpu.memory_space<vmem>>, %arg5: memref<2x128xf32, #tpu.memory_space<vmem>>, %arg6: memref<6x8x1xf32, #tpu.memory_space<vmem>>, %arg7: memref<6x1xf32, #tpu.memory_space<vmem>>, %arg8: memref<8x48xf32, #tpu.memory_space<vmem>>, %arg9: memref<8x1xf32, #tpu.memory_space<vmem>>, %arg10: memref<2x128xf32, #tpu.memory_space<vmem>>) attributes {dimension_semantics = [#tpu.dimension_semantics<parallel>], iteration_bounds = array<i64: 3>, scalar_prefetch = 0 : i64, scratch_operands = 0 : i64, tpu.core_type = #tpu.core_type<tc>, window_params = [{transform_indices = @transform_0, window_bounds = array<i64: 4, 8, 128>}, {transform_indices = @transform_1, window_bounds = array<i64: 2, 128>}, {transform_indices = @transform_2, window_bounds = array<i64: 5, 128>}, {transform_indices = @transform_3, window_bounds = array<i64: 5, 6, 128>}, {transform_indices = @transform_4, window_bounds = array<i64: 2, 128>}, {pipeline_mode = #tpu.pipeline_mode<synchronous>, transform_indices = @transform_5, window_bounds = array<i64: 6, 8, 1>}, {pipeline_mode = #tpu.pipeline_mode<synchronous>, transform_indices = @transform_6, window_bounds = array<i64: 6, 1>}, {pipeline_mode = #tpu.pipeline_mode<synchronous>, transform_indices = @transform_7, window_bounds = array<i64: 8, 48>}, {pipeline_mode = #tpu.pipeline_mode<synchronous>, transform_indices = @transform_8, window_bounds = array<i64: 8, 1>}, {transform_indices = @transform_9, window_bounds = array<i64: 2, 128>}]} {
    %c0 = arith.constant 0 : index
    %c0_0 = arith.constant 0 : index
    %c0_1 = arith.constant 0 : index
    %0 = vector.load %arg1[%c0, %c0_0, %c0_1] : memref<4x8x128xf32, #tpu.memory_space<vmem>>, vector<4x8x128xf32>
    %1 = vector.extract_strided_slice %0 {offsets = [0, 0, 0], sizes = [1, 8, 128], strides = [1, 1, 1]} : vector<4x8x128xf32> to vector<1x8x128xf32>
    %2 = vector.shape_cast %1 : vector<1x8x128xf32> to vector<8x128xf32>
    %3 = vector.extract_strided_slice %0 {offsets = [1, 0, 0], sizes = [1, 8, 128], strides = [1, 1, 1]} : vector<4x8x128xf32> to vector<1x8x128xf32>
    %4 = vector.shape_cast %3 : vector<1x8x128xf32> to vector<8x128xf32>
    %5 = vector.extract_strided_slice %0 {offsets = [2, 0, 0], sizes = [2, 8, 128], strides = [1, 1, 1]} : vector<4x8x128xf32> to vector<2x8x128xf32>
    %c0_2 = arith.constant 0 : index
    %c0_3 = arith.constant 0 : index
    %c0_4 = arith.constant 0 : index
    %6 = vector.load %arg6[%c0_2, %c0_3, %c0_4] : memref<6x8x1xf32, #tpu.memory_space<vmem>>, vector<6x8x1xf32>
    %c0_5 = arith.constant 0 : index
    %c0_6 = arith.constant 0 : index
    %7 = vector.load %arg3[%c0_5, %c0_6] : memref<5x128xf32, #tpu.memory_space<vmem>>, vector<5x128xf32>
    %cst = arith.constant dense<0xFF800000> : vector<128xf32>
    %8 = vector.multi_reduction <maximumf>, %7, %cst [0] : vector<5x128xf32> to vector<128xf32>
    %9 = vector.shape_cast %8 : vector<128xf32> to vector<1x128xf32>
    %10 = vector.broadcast %9 : vector<1x128xf32> to vector<5x128xf32>
    %11 = arith.subf %7, %10 : vector<5x128xf32>
    %12 = math.exp %11 : vector<5x128xf32>
    %cst_7 = arith.constant dense<0.000000e+00> : vector<128xf32>
    %13 = vector.multi_reduction <add>, %12, %cst_7 [0] : vector<5x128xf32> to vector<128xf32>
    %14 = vector.shape_cast %13 : vector<128xf32> to vector<1x128xf32>
    %15 = vector.broadcast %14 : vector<1x128xf32> to vector<5x128xf32>
    %16 = arith.divf %12, %15 : vector<5x128xf32>
    %c0_8 = arith.constant 0 : index
    %c0_9 = arith.constant 0 : index
    %c0_10 = arith.constant 0 : index
    %17 = vector.load %arg4[%c0_8, %c0_9, %c0_10] : memref<5x6x128xf32, #tpu.memory_space<vmem>>, vector<5x6x128xf32>
    %18 = vector.shape_cast %16 : vector<5x128xf32> to vector<5x1x128xf32>
    %19 = vector.broadcast %18 : vector<5x1x128xf32> to vector<5x6x128xf32>
    %20 = arith.mulf %17, %19 : vector<5x6x128xf32>
    %cst_11 = arith.constant dense<0.000000e+00> : vector<6x128xf32>
    %21 = vector.multi_reduction <add>, %20, %cst_11 [0] : vector<5x6x128xf32> to vector<6x128xf32>
    %cst_12 = arith.constant 5.000000e+00 : f32
    %22 = vector.broadcast %cst_12 : f32 to vector<6x128xf32>
    %23 = arith.divf %21, %22 : vector<6x128xf32>
    %24 = vector.shape_cast %23 : vector<6x128xf32> to vector<6x1x128xf32>
    %25 = vector.broadcast %6 : vector<6x8x1xf32> to vector<6x8x128xf32>
    %26 = vector.broadcast %24 : vector<6x1x128xf32> to vector<6x8x128xf32>
    %27 = arith.mulf %25, %26 : vector<6x8x128xf32>
    %28 = vector.shape_cast %27 : vector<6x8x128xf32> to vector<48x128xf32>
    %c0_13 = arith.constant 0 : index
    %c0_14 = arith.constant 0 : index
    %29 = vector.load %arg8[%c0_13, %c0_14] : memref<8x48xf32, #tpu.memory_space<vmem>>, vector<8x48xf32>
    %cst_15 = arith.constant dense<0.000000e+00> : vector<8x128xf32>
    %30 = tpu.matmul %29, %28, %cst_15 {dimension_numbers = #tpu.dot_dimension_numbers<[1], [0], [0], [1], [0, 0, 1, 1], [], []>, precision = #tpu.contract_precision<fp32>} : vector<8x48xf32>, vector<48x128xf32>, vector<8x128xf32> -> vector<8x128xf32>
    %c0_16 = arith.constant 0 : index
    %c0_17 = arith.constant 0 : index
    %31 = vector.load %arg9[%c0_16, %c0_17] : memref<8x1xf32, #tpu.memory_space<vmem>>, vector<8x1xf32>
    %32 = vector.broadcast %31 : vector<8x1xf32> to vector<8x128xf32>
    %33 = arith.addf %30, %32 : vector<8x128xf32>
    %cst_18 = arith.constant 0.000000e+00 : f32
    %34 = vector.broadcast %cst_18 : f32 to vector<8x128xf32>
    %35 = arith.maximumf %33, %34 : vector<8x128xf32>
    %36 = arith.addf %2, %4 : vector<8x128xf32>
    %37 = vector.shape_cast %36 : vector<8x128xf32> to vector<1x8x128xf32>
    %38 = vector.broadcast %6 : vector<6x8x1xf32> to vector<6x8x128xf32>
    %39 = arith.addf %38, %27 : vector<6x8x128xf32>
    %40 = vector.broadcast %37 : vector<1x8x128xf32> to vector<6x8x128xf32>
    %41 = arith.subf %40, %39 : vector<6x8x128xf32>
    %c0_19 = arith.constant 0 : index
    %c0_20 = arith.constant 0 : index
    %42 = vector.load %arg7[%c0_19, %c0_20] : memref<6x1xf32, #tpu.memory_space<vmem>>, vector<6x1xf32>
    %43 = arith.mulf %41, %41 : vector<6x8x128xf32>
    %cst_21 = arith.constant dense<0.000000e+00> : vector<6x128xf32>
    %44 = vector.multi_reduction <add>, %43, %cst_21 [1] : vector<6x8x128xf32> to vector<6x128xf32>
    %45 = vector.broadcast %42 : vector<6x1xf32> to vector<6x128xf32>
    %46 = arith.subf %45, %44 : vector<6x128xf32>
    %cst_22 = arith.constant dense<0xFF800000> : vector<128xf32>
    %47 = vector.multi_reduction <maximumf>, %46, %cst_22 [0] : vector<6x128xf32> to vector<128xf32>
    %48 = vector.shape_cast %47 : vector<128xf32> to vector<1x128xf32>
    %49 = vector.broadcast %48 : vector<1x128xf32> to vector<6x128xf32>
    %50 = arith.subf %46, %49 : vector<6x128xf32>
    %51 = math.exp %50 : vector<6x128xf32>
    %cst_23 = arith.constant dense<0.000000e+00> : vector<128xf32>
    %52 = vector.multi_reduction <add>, %51, %cst_23 [0] : vector<6x128xf32> to vector<128xf32>
    %53 = vector.shape_cast %52 : vector<128xf32> to vector<1x128xf32>
    %54 = vector.broadcast %53 : vector<1x128xf32> to vector<6x128xf32>
    %55 = arith.divf %51, %54 : vector<6x128xf32>
    %56 = tpu.iota {dimensions = array<i32: 1>} : vector<1x6x128xi32>
    %c0_24 = arith.constant 0 : index
    %c0_25 = arith.constant 0 : index
    %57 = vector.load %arg2[%c0_24, %c0_25] : memref<2x128xi32, #tpu.memory_space<vmem>>, vector<2x128xi32>
    %58 = vector.shape_cast %57 : vector<2x128xi32> to vector<2x1x128xi32>
    %59 = vector.broadcast %56 : vector<1x6x128xi32> to vector<2x6x128xi32>
    %60 = vector.broadcast %58 : vector<2x1x128xi32> to vector<2x6x128xi32>
    %61 = arith.cmpi eq, %59, %60 : vector<2x6x128xi32>
    %62 = arith.extui %61 : vector<2x6x128xi1> to vector<2x6x128xi32>
    %63 = arith.sitofp %62 : vector<2x6x128xi32> to vector<2x6x128xf32>
    %64 = vector.shape_cast %55 : vector<6x128xf32> to vector<1x6x128xf32>
    %65 = vector.broadcast %64 : vector<1x6x128xf32> to vector<2x6x128xf32>
    %66 = arith.mulf %65, %63 : vector<2x6x128xf32>
    %cst_26 = arith.constant dense<0.000000e+00> : vector<2x128xf32>
    %67 = vector.multi_reduction <add>, %66, %cst_26 [1] : vector<2x6x128xf32> to vector<2x128xf32>
    %68 = vector.shape_cast %63 : vector<2x6x128xf32> to vector<2x6x1x128xf32>
    %69 = vector.shape_cast %6 : vector<6x8x1xf32> to vector<1x6x8x1xf32>
    %70 = vector.broadcast %68 : vector<2x6x1x128xf32> to vector<2x6x8x128xf32>
    %71 = vector.broadcast %69 : vector<1x6x8x1xf32> to vector<2x6x8x128xf32>
    %72 = arith.mulf %70, %71 : vector<2x6x8x128xf32>
    %cst_27 = arith.constant dense<0.000000e+00> : vector<2x8x128xf32>
    %73 = vector.multi_reduction <add>, %72, %cst_27 [1] : vector<2x6x8x128xf32> to vector<2x8x128xf32>
    %74 = arith.addf %2, %35 : vector<8x128xf32>
    %75 = vector.shape_cast %74 : vector<8x128xf32> to vector<1x8x128xf32>
    %76 = vector.broadcast %75 : vector<1x8x128xf32> to vector<2x8x128xf32>
    %77 = arith.addf %76, %73 : vector<2x8x128xf32>
    %78 = arith.subf %77, %5 : vector<2x8x128xf32>
    %79 = arith.mulf %78, %78 : vector<2x8x128xf32>
    %80 = arith.addf %75, %75 : vector<1x8x128xf32>
    %81 = vector.broadcast %80 : vector<1x8x128xf32> to vector<2x8x128xf32>
    %82 = arith.subf %81, %5 : vector<2x8x128xf32>
    %83 = arith.mulf %82, %82 : vector<2x8x128xf32>
    %84 = arith.addf %79, %83 : vector<2x8x128xf32>
    %85 = vector.shape_cast %35 : vector<8x128xf32> to vector<1x8x128xf32>
    %86 = arith.addf %75, %85 : vector<1x8x128xf32>
    %87 = vector.broadcast %86 : vector<1x8x128xf32> to vector<2x8x128xf32>
    %88 = arith.subf %87, %5 : vector<2x8x128xf32>
    %89 = arith.mulf %88, %88 : vector<2x8x128xf32>
    %90 = arith.addf %84, %89 : vector<2x8x128xf32>
    %c0_28 = arith.constant 0 : index
    %c0_29 = arith.constant 0 : index
    %91 = vector.load %arg5[%c0_28, %c0_29] : memref<2x128xf32, #tpu.memory_space<vmem>>, vector<2x128xf32>
    %cst_30 = arith.constant dense<0.000000e+00> : vector<2x128xf32>
    %92 = vector.multi_reduction <add>, %90, %cst_30 [1] : vector<2x8x128xf32> to vector<2x128xf32>
    %93 = arith.mulf %67, %92 : vector<2x128xf32>
    %94 = arith.subf %91, %93 : vector<2x128xf32>
    %c0_31 = arith.constant 0 : index
    %c0_32 = arith.constant 0 : index
    %95 = vector.load %arg10[%c0_31, %c0_32] : memref<2x128xf32, #tpu.memory_space<vmem>>, vector<2x128xf32>
    tpu.vector_store %arg10[%c0_31, %c0_32], %94 {strides = array<i32>} : memref<2x128xf32, #tpu.memory_space<vmem>>, vector<2x128xf32>,
    return
  }
  func.func @transform_0(%arg0: i32) -> (i32, i32, i32) {
    %c0_i32 = arith.constant 0 : i32
    %c0_i32_0 = arith.constant 0 : i32
    %c0_i32_1 = arith.constant 0 : i32
    return %c0_i32, %c0_i32_0, %arg0 : i32, i32, i32
  }
  func.func @transform_1(%arg0: i32) -> (i32, i32) {
    %c0_i32 = arith.constant 0 : i32
    %c0_i32_0 = arith.constant 0 : i32
    return %c0_i32, %arg0 : i32, i32
  }
  func.func @transform_2(%arg0: i32) -> (i32, i32) {
    %c0_i32 = arith.constant 0 : i32
    %c0_i32_0 = arith.constant 0 : i32
    return %c0_i32, %arg0 : i32, i32
  }
  func.func @transform_3(%arg0: i32) -> (i32, i32, i32) {
    %c0_i32 = arith.constant 0 : i32
    %c0_i32_0 = arith.constant 0 : i32
    %c0_i32_1 = arith.constant 0 : i32
    return %c0_i32, %c0_i32_0, %arg0 : i32, i32, i32
  }
  func.func @transform_4(%arg0: i32) -> (i32, i32) {
    %c0_i32 = arith.constant 0 : i32
    %c0_i32_0 = arith.constant 0 : i32
    return %c0_i32, %arg0 : i32, i32
  }
  func.func @transform_5(%arg0: i32) -> (i32, i32, i32) {
    %c0_i32 = arith.constant 0 : i32
    %c0_i32_0 = arith.constant 0 : i32
    %c0_i32_1 = arith.constant 0 : i32
    %c0_i32_2 = arith.constant 0 : i32
    return %c0_i32, %c0_i32_0, %c0_i32_1 : i32, i32, i32
  }
  func.func @transform_6(%arg0: i32) -> (i32, i32) {
    %c0_i32 = arith.constant 0 : i32
    %c0_i32_0 = arith.constant 0 : i32
    %c0_i32_1 = arith.constant 0 : i32
    return %c0_i32, %c0_i32_0 : i32, i32
  }
  func.func @transform_7(%arg0: i32) -> (i32, i32) {
    %c0_i32 = arith.constant 0 : i32
    %c0_i32_0 = arith.constant 0 : i32
    %c0_i32_1 = arith.constant 0 : i32
    return %c0_i32, %c0_i32_0 : i32, i32
  }
  func.func @transform_8(%arg0: i32) -> (i32, i32) {
    %c0_i32 = arith.constant 0 : i32
    %c0_i32_0 = arith.constant 0 : i32
    %c0_i32_1 = arith.constant 0 : i32
    return %c0_i32, %c0_i32_0 : i32, i32
  }
  func.func @transform_9(%arg0: i32) -> (i32, i32) {
    %c0_i32 = arith.constant 0 : i32
    %c0_i32_0 = arith.constant 0 : i32
    return %c0_i32, %arg0 : i32, i32
  }
}

</mosaic_0001>

<bundles_post_ra>
// kernel: squeeze.8
= control target key start
LH: loop header
LB: loop body
LE: loop exit
PB: predicated region body
PF: predicated region fallthrough
CT: control target
= control target key end

     0   :  { %s46_s0 = inlined_call_operand.vmem [shape: f32[300], index: 0, kind: input, shape index: {}]   ;;  %s47_s1 = inlined_call_operand.vmem [shape: f32[1,300], index: 1, kind: output, shape index: {}]  }
   0x1   :  { %v4_v0 = vld [vmem:[%s46_s0] ss:$0 sm:$0xff]  ;;  %v14_v1 = vld [vmem:[%s46_s0 + $0x1] ss:$0 sm:$0xff]  ;;  %v16_v2 = vld [vmem:[%s46_s0 + $0x2] ss:$0 sm:$0xff] }
   0x2   :  { %5 = vst [vmem:[%s47_s1] sm:$0x1] %v4_v0  ;;  %15 = vst [vmem:[%s47_s1 + $0x1] sm:$0x1] %v14_v1 }
   0x3   :  { %17 = vst [vmem:[%s47_s1 + $0x2] sm:$0x1] %v16_v2 }

// kernel: ciscrec_forward.1
= control target key start
LH: loop header
LB: loop body
LE: loop exit
PB: predicated region body
PF: predicated region fallthrough
CT: control target
= control target key end

     0   :  { %s2073_s30 = smov 0   ;;  %s2075_s10 = smov 0   ;;  %s2445_s0 = inlined_call_operand.vmem [shape: f32[4,8,384], index: 0, kind: input, shape index: {}]   ;;  %s2446_s1 = inlined_call_operand.vmem [shape: s32[2,384], index: 1, kind: input, shape index: {}]   ;;  %s2447_s2 = inlined_call_operand.vmem [shape: f32[5,384], index: 2, kind: input, shape index: {}]   ;;  %s2448_s3 = inlined_call_operand.vmem [shape: f32[5,6,384], index: 3, kind: input, shape index: {}]   ;;  %s2449_s4 = inlined_call_operand.vmem [shape: f32[2,384], index: 4, kind: input, shape index: {}]   ;;  %s2450_s5 = inlined_call_operand.vmem [shape: f32[6,8,1], index: 5, kind: input, shape index: {}]   ;;  %s2451_s6 = inlined_call_operand.vmem [shape: f32[6,1], index: 6, kind: input, shape index: {}]   ;;  %s2452_s7 = inlined_call_operand.vmem [shape: f32[8,48], index: 7, kind: input, shape index: {}]   ;;  %s2453_s8 = inlined_call_operand.vmem [shape: f32[8,1], index: 8, kind: input, shape index: {}]   ;;  %s2454_s9 = inlined_call_operand.vmem [shape: f32[2,384], index: 9, kind: output, shape index: {}]  }
   0x1   :  { %s2077_s11 = smov 0  }
   0x2 LB: > { %s1739_s12 = sadd.s32 4294967295, %s2016_s11   ;;  %s2090_s13 = sadd.s32 1, %s2016_s11   ;;  %s2016_s11 = sphi %s2077_s11, %s2460_s11   ;;  %s2012_s10 = sphi %s2075_s10, %s2459_s10   ;;  %s2008_s30 = sphi %s2073_s30, %s2458_s30  }
   0x3   : > { %s23_s14 = ssub.s32 %s2016_s11, %s2090_s13  ;;  %s26_s15 = sadd.s32 1, %s2012_s10 }
   0x4   : > { %p24_p0 = scmp.eq.s32.totalorder %s23_s14, 0  ;;  %p33_p1 = scmp.ne.s32.totalorder %s2012_s10, %s2008_s30 }
   0x5   : > { %p34_p2 = scmp.eq.s32.totalorder %s2016_s11, 0  ;;  %p1742_p4 = scmp.ge.s32.totalorder %s2016_s11, 3 }
   0x6   : > { %s2099_s16 = scalar_select %p24_p0, %s2012_s10, %s26_s15  }
   0x7   : > { %p2101_p3 = por %p34_p2, %p33_p1  ;;  %285 = sbr.rel (%p1742_p4) target bundleno = 28 (0x1c), region = 32 }
   0xe   : > { %288 = sbr.rel (!%p2101_p3) target bundleno = 21 (0x15), region = 36  ;;  %s290_s18 = sand.u32 (%p2101_p3), 1, %s2012_s10  }
   0xf   : > { %s1744_s19 = sshll.u32 (%p2101_p3), %s2016_s11, 3  ;;  %s1743_s20 = sshll.u32 (%p2101_p3), %s290_s18, 5 }
  0x10   : > { %s294_s23 = scalar_lea.vmem (%p2101_p3), %s2445_s0, %s1744_s19  ;;  %s292_s24 = scalar_lea.vmem (%p2101_p3), [#allocation2], %s1743_s20 }
  0x11   : > { %v328_v0 = vld [vmem:[%s294_s23] sm:$0xff] (%p2101_p3)  ;;  %v330_v1 = vld [vmem:[%s294_s23 + $0x18] sm:$0xff] (%p2101_p3)  ;;  %v332_v2 = vld [vmem:[%s294_s23 + $0x30] sm:$0xff] (%p2101_p3) }
  0x12   : > { %329 = vst [vmem:[%s292_s24] sm:$0xff] (%p2101_p3), %v328_v0  ;;  %331 = vst [vmem:[%s292_s24 + $0x8] sm:$0xff] (%p2101_p3), %v330_v1  ;;  %v334_v3 = vld [vmem:[%s294_s23 + $0x48] sm:$0xff] (%p2101_p3) }
  0x13   : > { %333 = vst [vmem:[%s292_s24 + $0x10] sm:$0xff] (%p2101_p3), %v332_v2  ;;  %335 = vst [vmem:[%s292_s24 + $0x18] sm:$0xff] (%p2101_p3), %v334_v3 }
  0x15 PF: > { %355 = sbr.rel (!%p2101_p3) target bundleno = 28 (0x1c), region = 82  ;;  %s357_s25 = sand.u32 (%p2101_p3), 1, %s2012_s10  }
  0x16   : > { %s1745_s26 = sshll.u32 (%p2101_p3), %s2016_s11, 3  ;;  %s1953_s27 = smul.u32 (%p2101_p3), 40, %s357_s25 }
  0x17   : > { %s361_s14 = scalar_lea.vmem (%p2101_p3), %s2448_s3, %s1745_s26 }
  0x18   : > { %v397_v4 = vld [vmem:[%s361_s14] sm:$0xff] (%p2101_p3)  ;;  %v399_v5 = vld [vmem:[%s361_s14 + $0x18] sm:$0xff] (%p2101_p3)  ;;  %v401_v6 = vld [vmem:[%s361_s14 + $0x30] sm:$0xff] (%p2101_p3)  ;;  %s359_s15 = scalar_lea.vmem (%p2101_p3), [#allocation3], %s1953_s27 }
  0x19   : > { %v403_v7 = vld [vmem:[%s361_s14 + $0x48] sm:$0xff] (%p2101_p3)  ;;  %v405_v8 = vld [vmem:[%s361_s14 + $0x60] sm:$0xff] (%p2101_p3)  ;;  %398 = vst [vmem:[%s359_s15] sm:$0xff] (%p2101_p3), %v397_v4  ;;  %400 = vst [vmem:[%s359_s15 + $0x8] sm:$0xff] (%p2101_p3), %v399_v5 }
  0x1a   : > { %402 = vst [vmem:[%s359_s15 + $0x10] sm:$0xff] (%p2101_p3), %v401_v6  ;;  %404 = vst [vmem:[%s359_s15 + $0x18] sm:$0xff] (%p2101_p3), %v403_v7 }
  0x1b   : > { %406 = vst [vmem:[%s359_s15 + $0x20] sm:$0xff] (%p2101_p3), %v405_v8 }
  0x1c PF: > { %p1746_p5 = scmp.ge.s32.totalorder %s2016_s11, 1  ;;  %p418_p6 = scmp.lt.s32.totalorder %s2016_s11, 4 }
  0x1e   : > { %p419_p7 = pnand %p1746_p5, %p418_p6 }
  0x1f   : > { %v504_v9 = vld [vmem:[%s2450_s5 + $0x10] sm:$0xff] (!%p419_p7)  ;;  %v502_v10 = vld [vmem:[%s2450_s5] sm:$0xff] (!%p419_p7)  ;;  %v2018_v11 = vmov (!%p419_p7), 0   ;;  %v539_v12 = vlaneseq (!%p419_p7)  ;;  %v2019_v13 = vmov (!%p419_p7), 1966171168   ;;  %p482_p8 = scmp.lt.s32.totalorder (!%p419_p7), %s1739_s12, 2 }
  0x20   : > { %422 = sbr.rel (%p419_p7) target bundleno = 464 (0x1d0), region = 124  ;;  %1985 = vset.pattern.permute.xlu1 (!%p419_p7), %v2018_v11  ;;  %1984 = vset.pattern.permute.xlu0 (!%p419_p7), %v2018_v11  ;;  %v537_v14 = vunpack.c.l.s4 (!%p419_p7), %v2019_v13  ;;  %v505_v15 = vld [vmem:[%s2450_s5 + $0x18] sm:$0xff] (!%p419_p7)  ;;  %v503_v16 = vld [vmem:[%s2450_s5 + $0x8] sm:$0xff] (!%p419_p7)  ;;  %v506_v20 = vld [vmem:[%s2450_s5 + $0x20] sm:$0xff] (!%p419_p7)  ;;  %vm509_vm0 = vcmask (!%p419_p7), 1044480   ;;  %v2020_v36 = vmov (!%p419_p7), 0.0|0.0  }
  0x21   : > { %676 = vperm.xlu1 (!%p419_p7), %1985, %v504_v9   ;;  %666 = vperm.xlu0 (!%p419_p7), %1984, %v502_v10   ;;  %v2136_v18 = vshrl.u32 (!%p419_p7), %v539_v12, 7  ;;  %v507_v19 = vld [vmem:[%s2450_s5 + $0x28] sm:$0xff] (!%p419_p7)  ;;  %v731_v24 = vld [vmem:[%s2453_s8] sm:$0xff] (!%p419_p7)  ;;  %vm2021_vm3 = vmmov (!%p419_p7), 0   ;;  %v2022_v45 = vmov (!%p419_p7), 0.0   ;;  %s425_s24 = sand.u32 (!%p419_p7), 1, %s2008_s30  }
  0x22   : > { %v538_v17 = vunpack.c.0.s8 (!%p419_p7), %v537_v14  ;;  %v1266_v25 = vld [vmem:[%s2451_s6] sm:$0x3f] (!%p419_p7)  ;;  %1889 = vmatprep.subr.bf16.mxu1 (!%p419_p7), %v2020_v36  ;;  %1916 = vmatprep.subr.bf16.mxu0 (!%p419_p7), %v2020_v36  ;;  %s1954_s25 = smul.u32 (!%p419_p7), 40, %s425_s24  ;;  %vm604_vm4 = vcmask (!%p419_p7), 1045504   ;;  %s1747_s27 = sshll.u32 (!%p419_p7), %s425_s24, 5  ;;  %vm737_vm5 = vcmask (!%p419_p7), 392192  }
  0x23   : > { %v2165_v26 = vsub.s32 (!%p419_p7), 0, %v2136_v18  ;;  %1811 = vmatprep.mubr.msk.f32.mxu1 (!%p419_p7), %vm2021_vm3, %v2022_v45  ;;  %1856 = vmatprep.mubr.msk.f32.mxu0 (!%p419_p7), %vm2021_vm3, %v2022_v45  ;;  %s2238_s30 = scalar_lea.vmem (!%p419_p7), [#allocation2], %s1747_s27  ;;  %vm1320_vm6 = vcmask (!%p419_p7), 1041409   ;;  %vm1322_vm7 = vcmask (!%p419_p7), 1042434   ;;  %vm1324_vm8 = vcmask (!%p419_p7), 1043459  }
  0x24   : > { %v2149_v21 = vsub.s32 (!%p419_p7), %v538_v17, %v2136_v18  ;;  %s434_s26 = scalar_lea.vmem (!%p419_p7), [#allocation3], %s1954_s25  ;;  %vm1326_vm9 = vcmask (!%p419_p7), 1044484   ;;  %vm1328_vm10 = vcmask (!%p419_p7), 1045509  }
  0x25   : > { %681 = vperm.xlu1 (!%p419_p7), %1985, %v505_v15   ;;  %671 = vperm.xlu0 (!%p419_p7), %1984, %v503_v16   ;;  %v529_v62 = vld [vmem:[%s434_s26] sm:$0x3f] (!%p419_p7)  ;;  %v530_v63 = vld [vmem:[%s434_s26 + $0x8] sm:$0x3f] (!%p419_p7)  ;;  %v531_v5 = vld [vmem:[%s434_s26 + $0x10] sm:$0x3f] (!%p419_p7) }
  0x26   : > { %v532_v11 = vld [vmem:[%s434_s26 + $0x18] sm:$0x3f] (!%p419_p7)  ;;  %v533_v16 = vld [vmem:[%s434_s26 + $0x20] sm:$0x3f] (!%p419_p7) }
  0x27   : > { %s2462_s12 = smov (!%p482_p8, %s1739_s12), 2 }
  0x28   : > { %s2146_s29 = sshll.u32 %s2462_s12, 1  ;;  %s1749_s14 = sshll.u32 %s2462_s12, 3 }
  0x29   : > { %s485_s11 = scalar_lea.vmem %s2446_s1, %s2146_s29  ;;  %s489_s20 = scalar_lea.vmem %s2447_s2, %s1749_s14  ;;  %691 = vperm.xlu1 %1985, %v507_v19   ;;  %686 = vperm.xlu0 %1984, %v506_v20  }
  0x2a   : > { %v508_v22 = vld [vmem:[%s489_s20] sm:$0x1f]  ;;  %s497_s20 = scalar_lea.vmem %s2454_s9, %s2146_s29 }
  0x2b   : > { %v1752_v23 = vld.sshfl [vmem:[%s485_s11] sm:$0x11 pattern:$0x75316420]  ;;  %v510_v27 = vsel %vm509_vm0, %v508_v22, -inf  ;;  %s493_s11 = scalar_lea.vmem %s2449_s4, %s2146_s29 }
  0x2c   : > { %v1361_v28 = vcombine.high %v1752_v23, %v1752_v23  ;;  %v1368_v29 = vrot.slane %v1752_v23, %v2149_v21  ;;  %v511_v30 = vrot.slane %v510_v27, 4 }
  0x2d   : > { %734 = vperm.xlu1 %1985, %v731_v24   ;;  %1311 = vperm.xlu0 %1984, %v1266_v25  }
  0x2e   : > { %v1375_v31 = vrot.slane %v1361_v28, %v2149_v21  ;;  %v2171_v32 = vrot.slane %v1368_v29, %v2165_v26  ;;  %v512_v33 = vmax.f32 %v510_v27, %v511_v30 }
  0x30   : > { %v1383_v34 = vrot.slane %v1375_v31, %v2165_v26  ;;  %vm1384_vm1 = vcmp.eq.s32.totalorder %v2136_v18, %v2171_v32  ;;  %v513_v35 = vrot.slane %v512_v33, 2 }
  0x31   : > { %v2210_v25 = vsel %vm1384_vm1, 1.0, %v2022_v45 }
  0x32   : > { %vm2179_vm2 = vcmp.eq.s32.totalorder %v2136_v18, %v1383_v34  ;;  %v514_v38 = vmax.f32 %v512_v33, %v513_v35  ;;  %v1415_v29 = vrot.slane %v2210_v25, %v2149_v21  ;;  %v1408_v31 = vcombine.high %v2210_v25, %v2210_v25  ;;  %v730_v34 = vld [vmem:[%s2452_s7] sm:$0xff] }
  0x33   : > { %v2215_v27 = vsel %vm2179_vm2, 1.0, %v2022_v45 }
  0x34   : > { %v515_v39 = vrot.slane %v514_v38, 1  ;;  %v1462_v30 = vrot.slane %v2215_v27, %v2149_v21  ;;  %v1423_v32 = vcombine.high %v1415_v29, %v1415_v29  ;;  %v1455_v33 = vcombine.high %v2215_v27, %v2215_v27 }
  0x35   : > { %v1422_v37 = vrot.slane %v1408_v31, %v2149_v21 }
  0x36   : > { %v516_v40 = vmax.f32 %v514_v38, %v515_v39  ;;  %v1470_v35 = vcombine.high %v1462_v30, %v1462_v30 }
  0x38   : > { %v517_v41 = vsub.f32 %v508_v22, %v516_v40 }
  0x3a   : > { %v518_v42 = vmul.f32 1.442695, %v517_v41  ;;  %v739_v41 = vsel %vm737_vm5, %v730_v34, 0 }
  0x3c   : > { %1986 = vpow2.f32 %v518_v42  ;;  %v1431_v42 = vrot.slane %v1415_v29, %v2149_v21 }
  0x46   : > { %v1987_v43 = vpop.eup %1986 }
  0x47   : > { %v520_v44 = vsel %vm509_vm0, %v1987_v43, 0.0 }
  0x48   : > { %v521_v46 = vrot.slane %v520_v44, 4 }
  0x4a   : > { %v522_v47 = vadd.f32 %v521_v46, %v520_v44  ;;  %v1469_v44 = vrot.slane %v1455_v33, %v2149_v21  ;;  %v2241_v46 = vld [vmem:[%s2238_s30] sm:$0xff] }
  0x4c   : > { %v523_v48 = vrot.slane %v522_v47, 2 }
  0x4e   : > { %v524_v49 = vadd.f32 %v523_v48, %v522_v47  ;;  %v499_v47 = vld [vmem:[%s2238_s30 + $0x8] sm:$0xff]  ;;  %v1478_v48 = vrot.slane %v1462_v30, %v2149_v21 }
  0x50   : > { %v525_v50 = vrot.slane %v524_v49, 1 }
  0x52   : > { %v526_v51 = vadd.f32 %v525_v50, %v524_v49  ;;  %v2246_v49 = vrot.slane %v1470_v35, %v2149_v21  ;;  %v1424_v50 = vcombine.high %v1422_v37, %v1422_v37 }
  0x54   : > { %1988 = vrcp.f32 %v526_v51  ;;  %v1453_v51 = vcombine.high %v1431_v42, %v1431_v42 }
  0x5e   : > { %v1989_v52 = vpop.eup %1988 }
  0x5f   : > { %v528_v53 = vmul.f32 %v1989_v52, %v1987_v43  ;;  %v2235_v43 = vrot.slane %v1423_v32, %v2149_v21 }
  0x61   : > { %v542_v54 = vrot.slane %v528_v53, %v2149_v21  ;;  %v535_v58 = vcombine.high %v528_v53, %v528_v53 }
  0x63   : > { %v550_v55 = vcombine.high %v542_v54, %v542_v54  ;;  %v557_v56 = vrot.slane %v542_v54, %v2149_v21  ;;  %v549_v0 = vrot.slane %v535_v58, %v2149_v21  ;;  %v2250_v54 = vand.u32 4294901760, %v739_v41 }
  0x64   : > { %v1454_v58 = vcombine.high %v2235_v43, %v2235_v43 }
  0x65   : > { %v571_v57 = vrot.slane %v550_v55, %v2149_v21  ;;  %v572_v59 = vcombine.high %v557_v56, %v557_v56  ;;  %v577_v60 = vrot.slane %v557_v56, %v2165_v26  ;;  %v564_v6 = vrot.slane %v549_v0, %v2149_v21 }
  0x66   : > { %v1500_v56 = vcombine.high %v1478_v48, %v1478_v48  ;;  %v1513_v0 = vrot.slane %v1453_v51, %v2165_v26 }
  0x67   : > { %v581_v61 = vrot.slane %v571_v57, %v2165_v26  ;;  %v573_v1 = vcombine.high %v571_v57, %v571_v57  ;;  %v585_v2 = vrot.slane %v572_v59, %v2165_v26  ;;  %v599_v3 = vmul.f32 %v577_v60, %v529_v62 }
  0x68   : > { %v593_v13 = vrot.slane %v564_v6, %v2165_v26  ;;  %v2253_v57 = vadd.f32 %v499_v47, %v2241_v46  ;;  %v1471_v59 = vcombine.high %v1469_v44, %v1469_v44  ;;  %v1505_v60 = vrot.slane %v1431_v42, %v2165_v26 }
  0x69   : > { %v600_v4 = vmul.f32 %v581_v61, %v530_v63  ;;  %v589_v7 = vrot.slane %v573_v1, %v2165_v26  ;;  %v601_v8 = vmul.f32 %v585_v2, %v531_v5  ;;  %v605_v9 = vsel %vm604_vm4, %v599_v3, 0.0 }
  0x6a   : > { %v603_v19 = vmul.f32 %v593_v13, %v533_v16  ;;  %v1501_v61 = vcombine.high %v2246_v49, %v2246_v49  ;;  %v2261_v62 = vrot.slane %v1424_v50, %v2149_v21  ;;  %v1438_v63 = vrot.slane %v1422_v37, %v2149_v21 }
  0x6b   : > { %v606_v10 = vsel %vm604_vm4, %v600_v4, 0.0  ;;  %v602_v14 = vmul.f32 %v589_v7, %v532_v11  ;;  %v608_v15 = vsel %vm604_vm4, %v601_v8, 0.0  ;;  %v2266_v3 = vsub.f32 %v739_v41, %v2250_v54 }
  0x6c   : > { %v607_v12 = vadd.f32 %v606_v10, %v605_v9  ;;  %v612_v23 = vsel %vm604_vm4, %v603_v19, 0.0  ;;  %v1537_v5 = vrot.slane %v1500_v56, %v2165_v26  ;;  %v1529_v7 = vrot.slane %v1478_v48, %v2165_v26 }
  0x6d   : > { %v610_v20 = vsel %vm604_vm4, %v602_v14, 0.0  ;;  %v1517_v8 = vrot.slane %v1454_v58, %v2165_v26  ;;  %v1509_v9 = vrot.slane %v2235_v43, %v2165_v26  ;;  %v1533_v10 = vrot.slane %v2246_v49, %v2165_v26 }
  0x6e   : > { %v609_v17 = vadd.f32 %v608_v15, %v607_v12  ;;  %v1499_v11 = vrot.slane %v1471_v59, %v2149_v21  ;;  %v1541_v12 = vrot.slane %v1501_v61, %v2165_v26  ;;  %v1525_v13 = vrot.slane %v2261_v62, %v2165_v26 }
  0x6f   : > { %v1485_v14 = vrot.slane %v1469_v44, %v2149_v21  ;;  %v1521_v15 = vrot.slane %v1438_v63, %v2165_v26 }
  0x70   : > { %v611_v22 = vadd.f32 %v610_v20, %v609_v17  ;;  %v1549_v33 = vrot.slane %v1499_v11, %v2165_v26 }
  0x72   : > { %v613_v24 = vadd.f32 %v612_v23, %v611_v22  ;;  %v814_v23 = vand.u32 4294901760, %v2266_v3 }
  0x74   : > { %v615_v28 = vmul.f32 0.2, %v613_v24  ;;  %v2303_v43 = vsub.f32 %v2266_v3, %v814_v23 }
  0x76   : > { %v624_v18 = vrot.slane %v615_v28, %v2149_v21  ;;  %v617_v39 = vcombine.high %v615_v28, %v615_v28 }
  0x78   : > { %v632_v38 = vcombine.high %v624_v18, %v624_v18  ;;  %v640_v40 = vrot.slane %v624_v18, %v2149_v21  ;;  %v631_v53 = vrot.slane %v617_v39, %v2149_v21 }
  0x7a   : > { %v654_v52 = vrot.slane %v632_v38, %v2149_v21  ;;  %v662_v55 = vcombine.high %v640_v40, %v640_v40  ;;  %v633_v2 = vcombine.high %v631_v53, %v631_v53  ;;  %v697_v6 = vrot.slane %v640_v40, %v2165_v26 }
  0x7b   : > { %v647_v22 = vrot.slane %v631_v53, %v2149_v21 }
  0x7c   : > { %v663_v1 = vcombine.high %v654_v52, %v654_v52  ;;  %v705_v4 = vrot.slane %v662_v55, %v2165_v26  ;;  %v661_v20 = vrot.slane %v633_v2, %v2149_v21  ;;  %v701_v32 = vrot.slane %v654_v52, %v2165_v26 }
  0x7d   : > { %v1545_v21 = vrot.slane %v1485_v14, %v2165_v26  ;;  %v713_v41 = vrot.slane %v647_v22, %v2165_v26 }
  0x7e   : > { %v709_v19 = vrot.slane %v663_v1, %v2165_v26  ;;  %v717_v40 = vrot.slane %v661_v20, %v2165_v26 }
  0xa0   : > { %v677_v16 = vpop.permute.xlu1 %676  ;;  %v667_v17 = vpop.permute.xlu0 %666 }
  0xa1   : > { %v2287_v24 = vmul.f32 %v705_v4, %v677_v16  ;;  %v1564_v28 = vmul.f32 %v1513_v0, %v677_v16  ;;  %v1570_v29 = vmul.f32 %v1537_v5, %v677_v16  ;;  %v2289_v30 = vmul.f32 %v697_v6, %v667_v17 }
  0xa2   : > { %v1562_v31 = vmul.f32 %v1505_v60, %v667_v17  ;;  %v1568_v18 = vmul.f32 %v1529_v7, %v667_v17 }
  0xa3   : > { %v1256_v34 = vadd.f32 %v2287_v24, %v677_v16  ;;  %v1254_v35 = vadd.f32 %v2289_v30, %v667_v17  ;;  %v742_v37 = vand.u32 4294901760, %v2289_v30  ;;  %v748_v42 = vand.u32 4294901760, %v2287_v24 }
  0xa4   : > { %v682_v38 = vpop.permute.xlu1 %681  ;;  %v672_v39 = vpop.permute.xlu0 %671 }
  0xa5   : > { %v1262_v44 = vsub.f32 %v2253_v57, %v1256_v34  ;;  %v1260_v47 = vsub.f32 %v2253_v57, %v1254_v35  ;;  %v2307_v48 = vmul.f32 %v709_v19, %v682_v38  ;;  %v1565_v49 = vmul.f32 %v1517_v8, %v682_v38 }
  0xa6   : > { %v1571_v50 = vmul.f32 %v1541_v12, %v682_v38  ;;  %v725_v51 = vmul.f32 %v701_v32, %v672_v39  ;;  %v1563_v52 = vmul.f32 %v1509_v9, %v672_v39  ;;  %v1569_v53 = vmul.f32 %v1533_v10, %v672_v39 }
  0xa7   : > { %v1269_v55 = vmul.f32 %v1262_v44, %v1262_v44  ;;  %v1267_v26 = vmul.f32 %v1260_v47, %v1260_v47  ;;  %v1257_v56 = vadd.f32 %v2307_v48, %v682_v38  ;;  %v2313_v58 = vsub.f32 %v2289_v30, %v742_v37 }
  0xa8   : > { %v1255_v59 = vadd.f32 %v725_v51, %v672_v39  ;;  %v1574_v60 = vadd.f32 %v1563_v52, %v1562_v31  ;;  %v1579_v61 = vadd.f32 %v1569_v53, %v1568_v18  ;;  %v692_v62 = vpop.permute.xlu1 %691  ;;  %v745_v63 = vand.u32 4294901760, %v725_v51  ;;  %v687_v5 = vpop.permute.xlu0 %686 }
  0xa9   : > { %v1285_v0 = vrot.slane %v1269_v55, 4  ;;  %v1273_v1 = vrot.slane %v1267_v26, 4  ;;  %v1263_v2 = vsub.f32 %v2253_v57, %v1257_v56  ;;  %v2316_v4 = vmul.f32 %v717_v40, %v692_v62 }
  0xaa   : > { %v1261_v6 = vsub.f32 %v2253_v57, %v1255_v59  ;;  %v1575_v7 = vadd.f32 %v1574_v60, %v1564_v28  ;;  %v1580_v8 = vadd.f32 %v1579_v61, %v1570_v29  ;;  %v1567_v9 = vmul.f32 %v1525_v13, %v692_v62 }
  0xab   : > { %v1286_v10 = vadd.f32 %v1285_v0, %v1269_v55  ;;  %v1274_v11 = vadd.f32 %v1273_v1, %v1267_v26  ;;  %v1270_v12 = vmul.f32 %v1263_v2, %v1263_v2  ;;  %v1259_v14 = vadd.f32 %v2316_v4, %v692_v62 }
  0xac   : > { %v1268_v16 = vmul.f32 %v1261_v6, %v1261_v6  ;;  %v1573_v17 = vmul.f32 %v1549_v33, %v692_v62  ;;  %v728_v19 = vmul.f32 %v713_v41, %v687_v5  ;;  %v1566_v20 = vmul.f32 %v1521_v15, %v687_v5 }
  0xad   : > { %v1287_v22 = vrot.slane %v1286_v10, 2  ;;  %v1275_v31 = vrot.slane %v1274_v11, 2  ;;  %v1291_v18 = vrot.slane %v1270_v12, 4  ;;  %v1265_v32 = vsub.f32 %v2253_v57, %v1259_v14 }
  0xae   : > { %v1279_v34 = vrot.slane %v1268_v16, 4  ;;  %v1258_v35 = vadd.f32 %v728_v19, %v687_v5  ;;  %v1572_v38 = vmul.f32 %v1545_v21, %v687_v5  ;;  %v1576_v28 = vadd.f32 %v1575_v7, %v1565_v49 }
  0xaf   : > { %v1288_v29 = vadd.f32 %v1287_v22, %v1286_v10  ;;  %v1276_v13 = vadd.f32 %v1275_v31, %v1274_v11  ;;  %v1292_v39 = vadd.f32 %v1291_v18, %v1270_v12  ;;  %v1272_v40 = vmul.f32 %v1265_v32, %v1265_v32 }
  0xb0   : > { %v1280_v44 = vadd.f32 %v1279_v34, %v1268_v16  ;;  %v1264_v47 = vsub.f32 %v2253_v57, %v1258_v35  ;;  %v1577_v33 = vadd.f32 %v1576_v28, %v1566_v20  ;;  %v1581_v41 = vadd.f32 %v1580_v8, %v1571_v50 }
  0xb1   : > { %v1289_v15 = vrot.slane %v1288_v29, 1  ;;  %v1277_v52 = vrot.slane %v1276_v13, 1  ;;  %v1293_v53 = vrot.slane %v1292_v39, 2  ;;  %v1303_v55 = vrot.slane %v1272_v40, 4 }
  0xb2   : > { %v1281_v26 = vrot.slane %v1280_v44, 2  ;;  %v1271_v56 = vmul.f32 %v1264_v47, %v1264_v47  ;;  %v2322_v21 = vadd.f32 %v1577_v33, %v1567_v9  ;;  %v1582_v49 = vadd.f32 %v1581_v41, %v1572_v38 }
  0xb3   : > { %v1278_v59 = vadd.f32 %v1277_v52, %v1276_v13  ;;  %v1294_v60 = vadd.f32 %v1293_v53, %v1292_v39  ;;  %v2326_v61 = vpack.c.bf16 %v745_v63, %v742_v37  ;;  %v2328_v57 = vsub.f32 %v725_v51, %v745_v63 }
  0xb4   : > { %v1282_v50 = vadd.f32 %v1281_v26, %v1280_v44  ;;  %v1297_v62 = vrot.slane %v1271_v56, 4  ;;  %v2330_v0 = vadd.f32 %v1582_v49, %v1573_v17  ;;  %v1290_v1 = vadd.f32 %v1289_v15, %v1288_v29 }
  0xb5   : > { %1891 = vmatpush3.bf16.msra.mxu1 %v2326_v61  ;;  %1918 = vmatpush3.bf16.msra.mxu0 %v2326_v61  ;;  %v1295_v2 = vrot.slane %v1294_v60, 1  ;;  %v1304_v5 = vadd.f32 %v1303_v55, %v1272_v40  ;;  %v751_v6 = vand.u32 4294901760, %v2307_v48  ;;  %v2338_v30 = vsub.f32 %v2287_v24, %v748_v42 }
  0xb6   : > { %v1283_v37 = vrot.slane %v1282_v50, 1  ;;  %v1298_v51 = vadd.f32 %v1297_v62, %v1271_v56  ;;  %1892 = vmatprep.subr.bf16.mxu1 %v2020_v36  ;;  %1919 = vmatprep.subr.bf16.mxu0 %v2020_v36  ;;  %v754_v63 = vand.u32 4294901760, %v728_v19  ;;  %v757_v7 = vand.u32 4294901760, %v2316_v4  ;;  %v1312_v56 = vpop.permute.xlu0 %1311 }
  0xb7   : > { %v1296_v8 = vadd.f32 %v1295_v2, %v1294_v60  ;;  %v1305_v9 = vrot.slane %v1304_v5, 2  ;;  %v2345_v10 = vpack.c.bf16 %v751_v6, %v748_v42  ;;  %v2348_v11 = vsub.f32 %v2307_v48, %v751_v6 }
  0xb8   : > { %v1284_v12 = vadd.f32 %v1283_v37, %v1282_v50  ;;  %v1299_v14 = vrot.slane %v1298_v51, 2  ;;  %v2350_v16 = vpack.c.bf16 %v757_v7, %v754_v63  ;;  %v2352_v17 = vsub.f32 %v728_v19, %v754_v63 }
  0xb9   : > { %v1306_v20 = vadd.f32 %v1305_v9, %v1304_v5  ;;  %1894 = vmatpush3.bf16.msra.mxu1 %v2345_v10  ;;  %1921 = vmatpush3.bf16.msra.mxu0 %v2345_v10  ;;  %v2357_v22 = vsub.f32 %v2316_v4, %v757_v7  ;;  %v825_v24 = vand.u32 4294901760, %v2313_v58  ;;  %v832_v42 = vand.u32 4294901760, %v2328_v57 }
  0xba   : > { %v1300_v48 = vadd.f32 %v1299_v14, %v1298_v51  ;;  %v1321_v31 = vsel %vm1320_vm6, %v1284_v12, %v1278_v59  ;;  %1895 = vmatprep.subr.bf16.mxu1 %v2020_v36  ;;  %1922 = vmatprep.subr.bf16.mxu0 %v2020_v36  ;;  %v839_v19 = vand.u32 4294901760, %v2338_v30  ;;  %v846_v18 = vand.u32 4294901760, %v2348_v11 }
  0xbb   : > { %v1307_v32 = vrot.slane %v1306_v20, 1  ;;  %v1323_v34 = vsel %vm1322_vm7, %v1290_v1, %v1321_v31  ;;  %v826_v4 = vsub.f32 %v2313_v58, %v825_v24  ;;  %v833_v35 = vsub.f32 %v2328_v57, %v832_v42 }
  0xbc   : > { %v1301_v38 = vrot.slane %v1300_v48, 1  ;;  %v1325_v28 = vsel %vm1324_vm8, %v1296_v8, %v1323_v34  ;;  %v816_v29 = vand.u32 4294901760, %v2303_v43  ;;  %v840_v13 = vsub.f32 %v2338_v30, %v839_v19 }
  0xbd   : > { %v1308_v39 = vadd.f32 %v1307_v32, %v1306_v20  ;;  %1897 = vmatpush3.bf16.msra.mxu1 %v2350_v16  ;;  %1924 = vmatpush3.bf16.msra.mxu0 %v2350_v16  ;;  %v827_v40 = vand.u32 4294901760, %v826_v4  ;;  %v834_v44 = vand.u32 4294901760, %v833_v35  ;;  %v847_v47 = vsub.f32 %v2348_v11, %v846_v18 }
  0xbe   : > { %v1302_v33 = vadd.f32 %v1301_v38, %v1300_v48  ;;  %1898 = vmatprep.subr.bf16.mxu1 %v2020_v36  ;;  %1925 = vmatprep.subr.bf16.mxu0 %v2020_v36  ;;  %v853_v41 = vand.u32 4294901760, %v2352_v17  ;;  %v1926_v15 = vpack.c.bf16 %v832_v42, %v825_v24  ;;  %v860_v53 = vand.u32 4294901760, %v2357_v22 }
  0xbf   : > { %v1899_v43 = vpack.c.bf16 %v834_v44, %v827_v40  ;;  %v848_v52 = vand.u32 4294901760, %v847_v47  ;;  %v841_v59 = vand.u32 4294901760, %v840_v13  ;;  %v1929_v1 = vpack.c.bf16 %v846_v18, %v839_v19  ;;  %v501_v40 = vld [vmem:[%s2238_s30 + $0x18] sm:$0xff] }
  0xc0   : > { %v1327_v55 = vsel %vm1326_vm9, %v1302_v33, %v1325_v28  ;;  %1812 = vmatmul.mubr.f32.vlgmr.msra.gmra.mrb[0].mxu1 %v816_v29  ;;  %1857 = vmatmul.mubr.f32.vlgmr.msra.gmra.mrb[0].mxu0 %v814_v23  ;;  %v854_v26 = vsub.f32 %v2352_v17, %v853_v41  ;;  %v861_v60 = vsub.f32 %v2357_v22, %v860_v53 }
  0xc1   : > { %v1329_v49 = vsel %vm1328_vm10, %v1308_v39, %v1327_v55  ;;  %1900 = vmatpush3.bf16.msra.mxu1 %v1899_v43  ;;  %1927 = vmatpush3.bf16.msra.mxu0 %v1926_v15  ;;  %v1902_v62 = vpack.c.bf16 %v848_v52, %v841_v59  ;;  %v1932_v63 = vpack.c.bf16 %v860_v53, %v853_v41 }
  0xc2   : > { %v1331_v50 = vsub.f32 %v1312_v56, %v1329_v49  ;;  %1901 = vmatprep.subr.bf16.mxu1 %v2020_v36  ;;  %1928 = vmatprep.subr.bf16.mxu0 %v2020_v36  ;;  %v855_v2 = vand.u32 4294901760, %v854_v26  ;;  %v862_v5 = vand.u32 4294901760, %v861_v60  ;;  %v1908_v9 = vpack.c.bf16 %v2328_v57, %v2313_v58 }
  0xc3   : > { %1826 = vmatprep.mubr.msk.f32.mxu1 %vm2021_vm3, %v2022_v45  ;;  %1871 = vmatprep.mubr.msk.f32.mxu0 %vm2021_vm3, %v2022_v45  ;;  %v1911_v20 = vpack.c.bf16 %v2348_v11, %v2338_v30  ;;  %v1914_v57 = vpack.c.bf16 %v2357_v22, %v2352_v17 }
  0xc4   : > { %v1332_v23 = vsel %vm604_vm4, %v1331_v50, -inf  ;;  %v1905_v51 = vpack.c.bf16 %v862_v5, %v855_v2 }
  0xc5   : > { %v1333_v6 = vrot.slane %v1332_v23, 4  ;;  %1903 = vmatpush3.bf16.msra.mxu1 %v1902_v62  ;;  %1930 = vmatpush3.bf16.msra.mxu0 %v1929_v1 }
  0xc6   : > { %1904 = vmatprep.subr.bf16.mxu1 %v2020_v36  ;;  %1931 = vmatprep.subr.bf16.mxu0 %v2020_v36 }
  0xc7   : > { %v1334_v37 = vmax.f32 %v1332_v23, %v1333_v6 }
  0xc9   : > { %v1335_v7 = vrot.slane %v1334_v37, 2  ;;  %1906 = vmatpush3.bf16.msra.mxu1 %v1905_v51  ;;  %1933 = vmatpush3.bf16.msra.mxu0 %v1932_v63 }
  0xca   : > { %1907 = vmatprep.subr.bf16.mxu1 %v2020_v36  ;;  %1934 = vmatprep.subr.bf16.mxu0 %v2020_v36 }
  0xcb   : > { %v1336_v8 = vmax.f32 %v1334_v37, %v1335_v7 }
  0xcc   : > { %1827 = vmatmul.mubr.f32.vlgmr.msra.gmra.mrb[0].mxu1 %v2250_v54  ;;  %1872 = vmatmul.mubr.f32.vlgmr.msra.gmra.mrb[0].mxu0 %v2250_v54 }
  0xcd   : > { %v1337_v12 = vrot.slane %v1336_v8, 1  ;;  %1909 = vmatpush3.bf16.msra.mxu1 %v1908_v9  ;;  %1936 = vmatpush3.bf16.msra.mxu0 %v2326_v61 }
  0xce   : > { %1910 = vmatprep.subr.bf16.mxu1 %v2020_v36  ;;  %1937 = vmatprep.subr.bf16.mxu0 %v2020_v36 }
  0xcf   : > { %v1338_v14 = vmax.f32 %v1336_v8, %v1337_v12  ;;  %1841 = vmatprep.mubr.msk.f32.mxu1 %vm2021_vm3, %v2022_v45  ;;  %1886 = vmatprep.mubr.msk.f32.mxu0 %vm2021_vm3, %v2022_v45 }
  0xd1   : > { %v1339_v58 = vsub.f32 %v1331_v50, %v1338_v14  ;;  %1912 = vmatpush3.bf16.msra.mxu1 %v1911_v20  ;;  %1939 = vmatpush3.bf16.msra.mxu0 %v2345_v10 }
  0xd2   : > { %1913 = vmatprep.subr.bf16.mxu1 %v2020_v36  ;;  %1940 = vmatprep.subr.bf16.mxu0 %v2020_v36 }
  0xd3   : > { %v1340_v61 = vmul.f32 1.442695, %v1339_v58 }
  0xd5   : > { %1990 = vpow2.f32 %v1340_v61  ;;  %1915 = vmatpush3.bf16.msra.mxu1 %v1914_v57  ;;  %1942 = vmatpush3.bf16.msra.mxu0 %v2350_v16  ;;  %v735_v16 = vpop.permute.xlu1 %734 }
  0xd8   : > { %1842 = vmatmul.mubr.f32.vlgmr.msra.gmra.mrb[0].mxu1 %v2266_v3  ;;  %1887 = vmatmul.mubr.f32.vlgmr.msra.gmra.mrb[0].mxu0 %v2250_v54 }
  0xdf   : > { %v1991_v45 = vpop.eup %1990 }
  0xe0   : > { %v1342_v30 = vsel %vm604_vm4, %v1991_v45, 0.0 }
  0xe1   : > { %v1343_v10 = vrot.slane %v1342_v30, 4 }
  0xe3   : > { %v1344_v11 = vadd.f32 %v1343_v10, %v1342_v30 }
  0xe5   : > { %v1345_v24 = vrot.slane %v1344_v11, 2 }
  0xe7   : > { %v1346_v42 = vadd.f32 %v1345_v24, %v1344_v11 }
  0xe9   : > { %v1347_v36 = vrot.slane %v1346_v42, 1 }
  0xeb   : > { %v1348_v48 = vadd.f32 %v1347_v36, %v1346_v42  ;;  %v1605_v42 = vld [vmem:[%s493_s11] sm:$0x3] }
  0xed   : > { %1992 = vrcp.f32 %v1348_v48 }
  0xf7   : > { %v1993_v31 = vpop.eup %1992 }
  0xf8   : > { %v1350_v17 = vmul.f32 %v1993_v31, %v1991_v45 }
  0xfa   : > { %v1390_v22 = vmul.f32 %v2210_v25, %v1350_v17  ;;  %v1391_v3 = vmul.f32 %v2215_v27, %v1350_v17  ;;  %v500_v25 = vld [vmem:[%s2238_s30 + $0x10] sm:$0xff] }
  0xfc   : > { %v1392_v35 = vsel %vm604_vm4, %v1390_v22, 0.0  ;;  %v1399_v38 = vsel %vm604_vm4, %v1391_v3, 0.0 }
  0xfd   : > { %v1393_v13 = vrot.slane %v1392_v35, 4  ;;  %v1400_v39 = vrot.slane %v1399_v38, 4 }
  0xff   : > { %v1394_v53 = vadd.f32 %v1393_v13, %v1392_v35  ;;  %v1401_v55 = vadd.f32 %v1400_v39, %v1399_v38 }
 0x101   : > { %v1395_v2 = vrot.slane %v1394_v53, 2 }
 0x103   : > { %v1396_v51 = vadd.f32 %v1395_v2, %v1394_v53 }
 0x105   : > { %v1397_v14 = vrot.slane %v1396_v51, 1 }
 0x107   : > { %v1398_v30 = vadd.f32 %v1397_v14, %v1396_v51 }
 0x1ab   : > { %v1003_v54 = vpop.f32.mrb[0].mxu1  ;;  %v1248_v19 = vpop.f32.mrb[0].mxu0 }
 0x1ac   : > { %v1943_v18 = vadd.f32 %v1003_v54, %v735_v16  ;;  %v1843_v32 = vpop.f32.mrb[1].mxu1  ;;  %v1888_v34 = vpop.f32.mrb[1].mxu0 }
 0x1ae   : > { %v1944_v4 = vadd.f32 %v1943_v18, %v1248_v19 }
 0x1b0   : > { %v1252_v28 = vmax.f32 %v1944_v4, 0.0 }
 0x1b2   : > { %v1584_v29 = vadd.f32 %v1252_v28, %v2241_v46 }
 0x1b4   : > { %v1585_v27 = vadd.f32 %v1584_v29, %v2322_v21  ;;  %v1586_v44 = vadd.f32 %v1584_v29, %v2330_v0  ;;  %v1591_v47 = vadd.f32 %v1584_v29, %v1584_v29  ;;  %v1598_v33 = vadd.f32 %v1584_v29, %v1252_v28 }
 0x1b5   : > { %v1402_v0 = vrot.slane %v1401_v55, 2 }
 0x1b6   : > { %v1587_v41 = vsub.f32 %v1585_v27, %v500_v25  ;;  %v1588_v43 = vsub.f32 %v1586_v44, %v501_v40  ;;  %v1592_v15 = vsub.f32 %v1591_v47, %v500_v25  ;;  %v1593_v52 = vsub.f32 %v1591_v47, %v501_v40 }
 0x1b7   : > { %v1599_v26 = vsub.f32 %v1598_v33, %v500_v25  ;;  %v1600_v56 = vsub.f32 %v1598_v33, %v501_v40  ;;  %v1403_v63 = vadd.f32 %v1402_v0, %v1401_v55 }
 0x1b8   : > { %v1589_v49 = vmul.f32 %v1587_v41, %v1587_v41  ;;  %v1590_v46 = vmul.f32 %v1588_v43, %v1588_v43  ;;  %v1594_v59 = vmul.f32 %v1592_v15, %v1592_v15  ;;  %v1595_v60 = vmul.f32 %v1593_v52, %v1593_v52 }
 0x1b9   : > { %v1601_v1 = vmul.f32 %v1599_v26, %v1599_v26  ;;  %v1602_v21 = vmul.f32 %v1600_v56, %v1600_v56  ;;  %v1404_v20 = vrot.slane %v1403_v63, 1 }
 0x1ba   : > { %v1596_v50 = vadd.f32 %v1594_v59, %v1589_v49  ;;  %v1597_v62 = vadd.f32 %v1595_v60, %v1590_v46 }
 0x1bb   : > { %v1405_v10 = vadd.f32 %v1404_v20, %v1403_v63 }
 0x1bc   : > { %v1603_v5 = vadd.f32 %v1601_v1, %v1596_v50  ;;  %v1604_v23 = vadd.f32 %v1602_v21, %v1597_v62 }
 0x1be   : > { %v1606_v6 = vrot.slane %v1603_v5, 4  ;;  %v1612_v37 = vrot.slane %v1604_v23, 4 }
 0x1c0   : > { %v1607_v7 = vadd.f32 %v1606_v6, %v1603_v5  ;;  %v1613_v8 = vadd.f32 %v1612_v37, %v1604_v23 }
 0x1c2   : > { %v1608_v9 = vrot.slane %v1607_v7, 2  ;;  %v1614_v12 = vrot.slane %v1613_v8, 2 }
 0x1c4   : > { %v1609_v58 = vadd.f32 %v1608_v9, %v1607_v7  ;;  %v1615_v61 = vadd.f32 %v1614_v12, %v1613_v8 }
 0x1c6   : > { %v1610_v57 = vrot.slane %v1609_v58, 1  ;;  %v1616_v45 = vrot.slane %v1615_v61, 1 }
 0x1c8   : > { %v1611_v11 = vadd.f32 %v1610_v57, %v1609_v58  ;;  %v1617_v24 = vadd.f32 %v1616_v45, %v1615_v61 }
 0x1ca   : > { %v1618_v36 = vmul.f32 %v1611_v11, %v1398_v30  ;;  %v1619_v48 = vmul.f32 %v1617_v24, %v1405_v10 }
 0x1cc   : > { %v1622_v31 = vsel %vm1320_vm6, %v1619_v48, %v1618_v36 }
 0x1cd   : > { %v1624_v17 = vsub.f32 %v1605_v42, %v1622_v31 }
 0x1cf   : > { %1625 = vst [vmem:[%s497_s20] sm:$0x3] %v1624_v17 }
 0x1d0 PF: > { %p16_p9 = scmp.ge.s32.totalorder %s2090_s13, 5   ;;  %s2458_s30 = smov %s2012_s10 }
 0x1d1   : > { %s2459_s10 = smov %s2099_s16  ;;  %s2460_s11 = smov %s2090_s13 }
 0x1d2   :  { %18 = sbr.rel (!%p16_p9) target bundleno = 2 (0x2), region = 184 }

</bundles_post_ra>
